<compile_context>
chip_gen: v7x
topology: tpu7x:2x2x1
jax: 0.10.0
libtpu: 0.0.40
codegen_flags: <defaults>
</compile_context>

<pallas_src>
import functools

import jax
import jax.numpy as jnp
import numpy as np
from jax.experimental import pallas as pl
from jax.experimental.pallas import tpu as pltpu


def _cdiv(a, b):
    return -(-a // b)


def _lrn_kernel(x_ref, o_ref, pad_ref, *, alpha, beta, k, size):
    # x_ref / o_ref: (Bn, C, TW) tile of the (N, C, HW) tensor.
    # pad_ref: (Bn, C + 2r, TW) f32 VMEM scratch holding zero-padded squares.
    bn, C, tw = x_ref.shape
    r = (size - 1) // 2

    x = x_ref[...].astype(jnp.float32)
    x2 = x * x

    if r > 0:
        zpad = jnp.zeros((bn, r, tw), jnp.float32)
        pad_ref[:, pl.ds(0, r), :] = zpad           # top channel padding
        pad_ref[:, pl.ds(r + C, r), :] = zpad       # bottom channel padding
    pad_ref[:, pl.ds(r, C), :] = x2                 # center: the squares

    # Windowed sum over channels: s[c] = sum_{d=0}^{2r} pad[c + d]
    # (zero padding implements the [0, C-1] clipping exactly, in f32).
    s = pad_ref[:, pl.ds(0, C), :]
    for d in range(1, 2 * r + 1):
        s = s + pad_ref[:, pl.ds(d, C), :]

    scale = k + (alpha / size) * s
    # scale^(-beta) via exp/log on the EUP; scale > 0 as long as k > 0.
    inv = jnp.exp((-beta) * jnp.log(scale))
    o_ref[...] = (x * inv).astype(o_ref.dtype)


def _pick_tiles(N, C, HW, itemsize):
    """Pick (batch block Bn, lane tile TW, #lane tiles) so each grid step moves ~1 MiB."""
    LANE_CAP = 2048      # v7x-VMEM-safe lane tile; >=512 lanes ~85% of HBM roofline
    TARGET = 1 << 20     # ~1 MiB of input per grid step

    if HW <= LANE_CAP:
        tw = HW          # full spatial extent: always a legal block dim
    else:
        tw = LANE_CAP    # multiple of 128; partial boundary block gets masked
        while tw > 512 and C * tw * itemsize > TARGET:
            tw //= 2
    num_t = _cdiv(HW, tw)

    bn = max(1, min(N, TARGET // max(1, C * tw * itemsize)))
    # Keep at least ~4 grid steps when possible (v7x has 2 TensorCores).
    while bn > 1 and _cdiv(N, bn) * num_t < 4:
        bn = _cdiv(bn, 2)
    return bn, tw, num_t


@functools.partial(jax.jit, static_argnames=("size", "alpha", "beta", "k"))
def spatial_cross_map_lrn(x, size, alpha=0.0001, beta=0.75, k=1.0):
    N, C, H, W = x.shape
    HW = H * W
    r = (int(size) - 1) // 2

    xf = x.reshape(N, C, HW)  # free: collapses trailing dims, no data movement
    bn, tw, num_t = _pick_tiles(N, C, HW, x.dtype.itemsize)

    kernel = functools.partial(
        _lrn_kernel, alpha=float(alpha), beta=float(beta), k=float(k),
        size=int(size))

    out = pl.pallas_call(
        kernel,
        out_shape=jax.ShapeDtypeStruct((N, C, HW), x.dtype),
        grid_spec=pltpu.PrefetchScalarGridSpec(
            num_scalar_prefetch=0,
            grid=(_cdiv(N, bn), num_t),
            in_specs=[pl.BlockSpec((bn, C, tw), lambda b, t: (b, 0, t))],
            out_specs=pl.BlockSpec((bn, C, tw), lambda b, t: (b, 0, t)),
            scratch_shapes=[pltpu.VMEM((bn, C + 2 * r, tw), jnp.float32)],
        ),
        compiler_params=pltpu.CompilerParams(
            dimension_semantics=("parallel", "parallel")),
    )(xf)

    return out.reshape(N, C, H, W)


def _reference_lrn(x, size, alpha=0.0001, beta=0.75, k=1.0):
    # Pure-JAX reference mirroring legacy Torch semantics.
    N, C, H, W = x.shape
    r = (size - 1) // 2
    x2 = x.astype(jnp.float32) ** 2
    sums = []
    for c in range(C):
        lo = max(0, c - r)
        hi = min(C - 1, c + r)
        sums.append(jnp.sum(x2[:, lo:hi + 1], axis=1))
    s = jnp.stack(sums, axis=1)
    scale = k + (alpha / size) * s
    return (x.astype(jnp.float32) * scale ** (-beta)).astype(x.dtype)


if __name__ == "__main__":
    key = jax.random.PRNGKey(0)
    N, C, H, W = 2, 8, 16, 16
    size, alpha, beta, k = 5, 0.0001, 0.75, 1.0

    x = jax.random.normal(key, (N, C, H, W), dtype=jnp.float32)

    out = spatial_cross_map_lrn(x, size, alpha, beta, k)
    out = jax.block_until_ready(out)

    ref = _reference_lrn(x, size, alpha, beta, k)
    np.testing.assert_allclose(np.asarray(out), np.asarray(ref),
                               rtol=1e-5, atol=1e-5)
    print("KERNEL_OK")
</pallas_src>

<mosaic_0001>
module attributes {stable_mosaic.version = 11 : i64} {
  func.func @_lrn_kernel(%arg0: i32, %arg1: i32, %arg2: memref<1x8x256xf32, #tpu.memory_space<vmem>>, %arg3: memref<1x8x256xf32, #tpu.memory_space<vmem>>, %arg4: memref<1x12x256xf32, #tpu.memory_space<vmem>>) attributes {dimension_semantics = [#tpu.dimension_semantics<parallel>, #tpu.dimension_semantics<parallel>], iteration_bounds = array<i64: 2, 1>, scalar_prefetch = 0 : i64, scratch_operands = 1 : i64, tpu.core_type = #tpu.core_type<tc>, window_params = [{transform_indices = @transform_0, window_bounds = array<i64: 1, 8, 256>}, {transform_indices = @transform_1, window_bounds = array<i64: 1, 8, 256>}]} {
    %c0 = arith.constant 0 : index
    %c0_0 = arith.constant 0 : index
    %c0_1 = arith.constant 0 : index
    %0 = vector.load %arg2[%c0, %c0_0, %c0_1] : memref<1x8x256xf32, #tpu.memory_space<vmem>>, vector<1x8x256xf32>
    %1 = arith.mulf %0, %0 : vector<1x8x256xf32>
    %cst = arith.constant 0.000000e+00 : f32
    %2 = vector.broadcast %cst : f32 to vector<1x2x256xf32>
    %c0_2 = arith.constant 0 : index
    %c0_3 = arith.constant 0 : index
    %c0_4 = arith.constant 0 : index
    %3 = vector.load %arg4[%c0_2, %c0_3, %c0_4] : memref<1x12x256xf32, #tpu.memory_space<vmem>>, vector<1x2x256xf32>
    tpu.vector_store %arg4[%c0_2, %c0_3, %c0_4], %2 {strides = array<i32>} : memref<1x12x256xf32, #tpu.memory_space<vmem>>, vector<1x2x256xf32>,
    %c0_5 = arith.constant 0 : index
    %c10 = arith.constant 10 : index
    %c0_6 = arith.constant 0 : index
    %4 = vector.load %arg4[%c0_5, %c10, %c0_6] : memref<1x12x256xf32, #tpu.memory_space<vmem>>, vector<1x2x256xf32>
    tpu.vector_store %arg4[%c0_5, %c10, %c0_6], %2 {strides = array<i32>} : memref<1x12x256xf32, #tpu.memory_space<vmem>>, vector<1x2x256xf32>,
    %c0_7 = arith.constant 0 : index
    %c2 = arith.constant 2 : index
    %c0_8 = arith.constant 0 : index
    %5 = vector.load %arg4[%c0_7, %c2, %c0_8] : memref<1x12x256xf32, #tpu.memory_space<vmem>>, vector<1x8x256xf32>
    tpu.vector_store %arg4[%c0_7, %c2, %c0_8], %1 {strides = array<i32>} : memref<1x12x256xf32, #tpu.memory_space<vmem>>, vector<1x8x256xf32>,
    %c0_9 = arith.constant 0 : index
    %c0_10 = arith.constant 0 : index
    %c0_11 = arith.constant 0 : index
    %6 = vector.load %arg4[%c0_9, %c0_10, %c0_11] : memref<1x12x256xf32, #tpu.memory_space<vmem>>, vector<1x8x256xf32>
    %c0_12 = arith.constant 0 : index
    %c1 = arith.constant 1 : index
    %c0_13 = arith.constant 0 : index
    %7 = vector.load %arg4[%c0_12, %c1, %c0_13] : memref<1x12x256xf32, #tpu.memory_space<vmem>>, vector<1x8x256xf32>
    %8 = arith.addf %6, %7 : vector<1x8x256xf32>
    %c0_14 = arith.constant 0 : index
    %c2_15 = arith.constant 2 : index
    %c0_16 = arith.constant 0 : index
    %9 = vector.load %arg4[%c0_14, %c2_15, %c0_16] : memref<1x12x256xf32, #tpu.memory_space<vmem>>, vector<1x8x256xf32>
    %10 = arith.addf %8, %9 : vector<1x8x256xf32>
    %c0_17 = arith.constant 0 : index
    %c3 = arith.constant 3 : index
    %c0_18 = arith.constant 0 : index
    %11 = vector.load %arg4[%c0_17, %c3, %c0_18] : memref<1x12x256xf32, #tpu.memory_space<vmem>>, vector<1x8x256xf32>
    %12 = arith.addf %10, %11 : vector<1x8x256xf32>
    %c0_19 = arith.constant 0 : index
    %c4 = arith.constant 4 : index
    %c0_20 = arith.constant 0 : index
    %13 = vector.load %arg4[%c0_19, %c4, %c0_20] : memref<1x12x256xf32, #tpu.memory_space<vmem>>, vector<1x8x256xf32>
    %14 = arith.addf %12, %13 : vector<1x8x256xf32>
    %cst_21 = arith.constant 2.000000e-05 : f32
    %15 = vector.broadcast %cst_21 : f32 to vector<1x8x256xf32>
    %16 = arith.mulf %15, %14 : vector<1x8x256xf32>
    %cst_22 = arith.constant 1.000000e+00 : f32
    %17 = vector.broadcast %cst_22 : f32 to vector<1x8x256xf32>
    %18 = arith.addf %17, %16 : vector<1x8x256xf32>
    %19 = math.log %18 : vector<1x8x256xf32>
    %cst_23 = arith.constant -7.500000e-01 : f32
    %20 = vector.broadcast %cst_23 : f32 to vector<1x8x256xf32>
    %21 = arith.mulf %20, %19 : vector<1x8x256xf32>
    %22 = math.exp %21 : vector<1x8x256xf32>
    %23 = arith.mulf %0, %22 : vector<1x8x256xf32>
    %c0_24 = arith.constant 0 : index
    %c0_25 = arith.constant 0 : index
    %c0_26 = arith.constant 0 : index
    %24 = vector.load %arg3[%c0_24, %c0_25, %c0_26] : memref<1x8x256xf32, #tpu.memory_space<vmem>>, vector<1x8x256xf32>
    tpu.vector_store %arg3[%c0_24, %c0_25, %c0_26], %23 {strides = array<i32>} : memref<1x8x256xf32, #tpu.memory_space<vmem>>, vector<1x8x256xf32>,
    return
  }
  func.func @transform_0(%arg0: i32, %arg1: i32) -> (i32, i32, i32) {
    %c0_i32 = arith.constant 0 : i32
    %c0_i32_0 = arith.constant 0 : i32
    return %arg0, %c0_i32, %arg1 : i32, i32, i32
  }
  func.func @transform_1(%arg0: i32, %arg1: i32) -> (i32, i32, i32) {
    %c0_i32 = arith.constant 0 : i32
    %c0_i32_0 = arith.constant 0 : i32
    return %arg0, %c0_i32, %arg1 : i32, i32, i32
  }
}

</mosaic_0001>

<bundles_post_ra>
// kernel: spatial_cross_map_lrn.1
= control target key start
LH: loop header
LB: loop body
LE: loop exit
PB: predicated region body
PF: predicated region fallthrough
CT: control target
= control target key end

     0   :  { %s438_s6 = smov 0   ;;  %s440_s7 = smov 0   ;;  %s496_s0 = inlined_call_operand.vmem [shape: f32[2,8,256], index: 0, kind: input, shape index: {}]   ;;  %s497_s1 = inlined_call_operand.vmem [shape: f32[2,8,256], index: 1, kind: output, shape index: {}]  }
   0x1   :  { %s442_s8 = smov 0  }
   0x2 LB: > { %s23_s9 = sadd.s32 1, %s421_s7  ;;  %p361_p0 = scmp.ge.s32.totalorder %s425_s8, 1  ;;  %s425_s8 = sphi %s442_s8, %s11_s8   ;;  %s421_s7 = sphi %s440_s7, %s499_s7   ;;  %s417_s6 = sphi %s438_s6, %s498_s6  }
   0x3   : > { %p25_p1 = scmp.ge.s32.totalorder %s23_s9, 2  ;;  %p108_p2 = scmp.lt.s32.totalorder %s425_s8, 3 }
   0x5   : > { %s501_s9 = smov (%p25_p1, %s23_s9), 0  ;;  %p109_p3 = pnand %p361_p0, %p108_p2 }
   0x6   : > { %p137_p4 = scmp.lt.s32.totalorder (!%p109_p3), %s417_s6, 1  ;;  %v427_v0 = vmov (!%p109_p3), 0.0   ;;  %vm184_vm0 = vcmask (!%p109_p3), 1046528   ;;  %vm203_vm1 = vcmask (!%p109_p3), 1045504   ;;  %vm222_vm2 = vcmask (!%p109_p3), 1044480  }
   0x7   : > { %112 = sbr.rel (%p109_p3) target bundleno = 81 (0x51), region = 24  ;;  %160 = vst [vmem:[#allocation2] sm:$0x3] (!%p109_p3), %v427_v0  ;;  %161 = vst [vmem:[#allocation2 + $0x8] sm:$0x3] (!%p109_p3), %v427_v0  ;;  %vm241_vm3 = vcmask (!%p109_p3), 1043456  }
   0x8   : > { %162 = vst [vmem:[#allocation2 + $0x10] sm:$0xc] (!%p109_p3), %v427_v0  ;;  %163 = vst [vmem:[#allocation2 + $0x18] sm:$0xc] (!%p109_p3), %v427_v0 }
   0xe   : > { %s503_s6 = smov (!%p137_p4, %s417_s6), 1 }
   0xf   : > { %s368_s10 = sshll.u32 %s503_s6, 4 }
  0x10   : > { %s144_s13 = scalar_lea.vmem %s496_s0, %s368_s10  ;;  %s154_s16 = scalar_lea.vmem %s497_s1, %s368_s10 }
  0x11   : > { %v464_v1 = vld [vmem:[%s144_s13] sm:$0xff]  ;;  %v466_v2 = vld [vmem:[%s144_s13 + $0x8] sm:$0xff] }
  0x12   : > { %v158_v3 = vmul.f32 %v464_v1, %v464_v1  ;;  %v159_v4 = vmul.f32 %v466_v2, %v466_v2 }
  0x14   : > { %v166_v5 = vrot.slane %v158_v3, 6  ;;  %v167_v6 = vrot.slane %v159_v4, 6 }
  0x16   : > { %170 = vst [vmem:[#allocation2] sm:$0xfc] %v166_v5  ;;  %172 = vst [vmem:[#allocation2 + $0x10] sm:$0x3] %v166_v5 }
  0x17   : > { %171 = vst [vmem:[#allocation2 + $0x8] sm:$0xfc] %v167_v6  ;;  %173 = vst [vmem:[#allocation2 + $0x18] sm:$0x3] %v167_v6 }
  0x1d   : > { %v176_v7 = vld [vmem:[#allocation2] sm:$0xfe]  ;;  %v178_v8 = vld [vmem:[#allocation2 + $0x10] sm:$0x1] }
  0x1e   : > { %v174_v9 = vld [vmem:[#allocation2] sm:$0xff]  ;;  %v185_v10 = vrot.slane %v176_v7, 1  ;;  %v186_v11 = vrot.slane %v178_v8, 1  ;;  %v197_v13 = vld [vmem:[#allocation2 + $0x10] sm:$0x3]  ;;  %v175_v41 = vld [vmem:[#allocation2 + $0x8] sm:$0xff] }
  0x1f   : > { %v195_v12 = vld [vmem:[#allocation2] sm:$0xfc]  ;;  %v205_v15 = vrot.slane %v197_v13, 2  ;;  %v216_v17 = vld [vmem:[#allocation2 + $0x10] sm:$0x7] }
  0x20   : > { %v204_v14 = vrot.slane %v195_v12, 2  ;;  %v214_v16 = vld [vmem:[#allocation2] sm:$0xf8]  ;;  %v187_v18 = vsel %vm184_vm0, %v185_v10, %v186_v11  ;;  %v224_v20 = vrot.slane %v216_v17, 3  ;;  %v235_v22 = vld [vmem:[#allocation2 + $0x10] sm:$0xf] }
  0x21   : > { %v223_v19 = vrot.slane %v214_v16, 3  ;;  %v233_v21 = vld [vmem:[#allocation2] sm:$0xf0]  ;;  %v193_v23 = vadd.f32 %v187_v18, %v174_v9  ;;  %v177_v25 = vld [vmem:[#allocation2 + $0x8] sm:$0xfe]  ;;  %v243_v27 = vrot.slane %v235_v22, 4 }
  0x22   : > { %v242_v24 = vrot.slane %v233_v21, 4  ;;  %v206_v26 = vsel %vm203_vm1, %v204_v14, %v205_v15  ;;  %v179_v28 = vld [vmem:[#allocation2 + $0x18] sm:$0x1]  ;;  %v188_v29 = vrot.slane %v177_v25, 1  ;;  %v196_v30 = vld [vmem:[#allocation2 + $0x8] sm:$0xfc] }
  0x23   : > { %v212_v31 = vadd.f32 %v206_v26, %v193_v23  ;;  %v189_v32 = vrot.slane %v179_v28, 1  ;;  %v198_v33 = vld [vmem:[#allocation2 + $0x18] sm:$0x3]  ;;  %v207_v34 = vrot.slane %v196_v30, 2  ;;  %v215_v35 = vld [vmem:[#allocation2 + $0x8] sm:$0xf8]  ;;  %v225_v36 = vsel %vm222_vm2, %v223_v19, %v224_v20 }
  0x24   : > { %v208_v37 = vrot.slane %v198_v33, 2  ;;  %v217_v38 = vld [vmem:[#allocation2 + $0x18] sm:$0x7]  ;;  %v234_v39 = vld [vmem:[#allocation2 + $0x8] sm:$0xf0]  ;;  %v226_v43 = vrot.slane %v215_v35, 3  ;;  %v244_v46 = vsel %vm241_vm3, %v242_v24, %v243_v27 }
  0x25   : > { %v231_v40 = vadd.f32 %v225_v36, %v212_v31  ;;  %v190_v42 = vsel %vm184_vm0, %v188_v29, %v189_v32  ;;  %v227_v44 = vrot.slane %v217_v38, 3  ;;  %v236_v45 = vld [vmem:[#allocation2 + $0x18] sm:$0xf]  ;;  %v245_v50 = vrot.slane %v234_v39, 4 }
  0x26   : > { %v194_v47 = vadd.f32 %v190_v42, %v175_v41  ;;  %v209_v49 = vsel %vm203_vm1, %v207_v34, %v208_v37  ;;  %v246_v51 = vrot.slane %v236_v45, 4 }
  0x27   : > { %v250_v48 = vadd.f32 %v244_v46, %v231_v40  ;;  %v228_v54 = vsel %vm222_vm2, %v226_v43, %v227_v44 }
  0x28   : > { %v213_v52 = vadd.f32 %v209_v49, %v194_v47  ;;  %v247_v57 = vsel %vm241_vm3, %v245_v50, %v246_v51 }
  0x29   : > { %v252_v53 = vmul.f32 2e-05, %v250_v48 }
  0x2a   : > { %v232_v55 = vadd.f32 %v228_v54, %v213_v52 }
  0x2b   : > { %v254_v56 = vadd.f32 1.0, %v252_v53 }
  0x2c   : > { %v251_v58 = vadd.f32 %v247_v57, %v232_v55 }
  0x2d   : > { %395 = vlog2.f32 %v254_v56 }
  0x2e   : > { %v253_v59 = vmul.f32 2e-05, %v251_v58 }
  0x30   : > { %v255_v60 = vadd.f32 1.0, %v253_v59 }
  0x32   : > { %397 = vlog2.f32 %v255_v60 }
  0x37   : > { %v396_v61 = vpop.eup %395 }
  0x38   : > { %v257_v62 = vmul.f32 0.6931472, %v396_v61 }
  0x3a   : > { %v260_v63 = vmul.f32 -0.75, %v257_v62 }
  0x3c   : > { %v398_v0 = vpop.eup %397  ;;  %v262_v3 = vmul.f32 1.442695, %v260_v63 }
  0x3d   : > { %v259_v4 = vmul.f32 0.6931472, %v398_v0 }
  0x3e   : > { %399 = vpow2.f32 %v262_v3 }
  0x3f   : > { %v261_v5 = vmul.f32 -0.75, %v259_v4 }
  0x41   : > { %v264_v6 = vmul.f32 1.442695, %v261_v5 }
  0x43   : > { %401 = vpow2.f32 %v264_v6 }
  0x48   : > { %v400_v7 = vpop.eup %399 }
  0x49   : > { %v266_v8 = vmul.f32 %v400_v7, %v464_v1 }
  0x4b   : > { %268 = vst [vmem:[%s154_s16] sm:$0xff] %v266_v8 }
  0x4d   : > { %v402_v9 = vpop.eup %401 }
  0x4e   : > { %v267_v10 = vmul.f32 %v402_v9, %v466_v2 }
  0x50   : > { %269 = vst [vmem:[%s154_s16 + $0x8] sm:$0xff] %v267_v10 }
  0x51 PF: > { %s11_s8 = sadd.s32 1, %s425_s8   ;;  %s498_s6 = smov %s421_s7 }
  0x52   : > { %p8_p5 = scmp.ge.s32.totalorder %s11_s8, 4   ;;  %s499_s7 = smov %s501_s9 }
  0x54   :  { %10 = sbr.rel (!%p8_p5) target bundleno = 2 (0x2), region = 54 }

</bundles_post_ra>
